<compile_context>
chip_gen: v5e
topology: v5e:2x2
jax: 0.10.0
libtpu: 0.0.40
codegen_flags: <defaults>
</compile_context>

<pallas_src>
import math
import functools

import numpy as np
import jax
import jax.numpy as jnp
from jax.experimental import pallas as pl
from jax.experimental.pallas import tpu as pltpu


_VMEM_LIMIT = 32 * 1024 * 1024


# --------------------------------------------------------------------------
# small helpers
# --------------------------------------------------------------------------

def _pick_block_rows(m, target=512):
    """Largest row block <= target that divides m (whole array if m small)."""
    if m <= target:
        return m
    for cand in (512, 256, 128, 64, 32, 16, 8):
        if m % cand == 0:
            return cand
    return m


def _mxu(a, b):
    """bf16-in / f32-accumulate matmul (no-op cast if operand already bf16)."""
    return jnp.dot(a.astype(jnp.bfloat16), b.astype(jnp.bfloat16),
                   preferred_element_type=jnp.float32)


def _layer_norm(y, g, b, eps=1e-5):
    mu = jnp.mean(y, axis=-1, keepdims=True)
    var = jnp.mean(jnp.square(y - mu), axis=-1, keepdims=True)
    return (y - mu) * jax.lax.rsqrt(var + eps) * g + b


def make_pair_swap(f):
    """(F, F) matrix P so that (x @ P)[2i] = -x[2i+1], (x @ P)[2i+1] = x[2i].

    Only used at parameter-setup time (RoPE rotate-half folded into Wq / Wk),
    never inside a kernel.
    """
    p = np.zeros((f, f), np.float32)
    idx = np.arange(f // 2)
    p[2 * idx + 1, 2 * idx] = -1.0
    p[2 * idx, 2 * idx + 1] = 1.0
    return jnp.asarray(p)


# --------------------------------------------------------------------------
# Pallas kernels
# --------------------------------------------------------------------------

def _linear_kernel(x_ref, w_ref, b_ref, o_ref):
    # x: (bm, K) f32, w: (K, N) bf16, b: (1, N) f32 -> o: (bm, N) f32
    o_ref[...] = (_mxu(x_ref[...], w_ref[...]) + b_ref[...]).astype(o_ref.dtype)


def _rotary3d_kernel(xyz_ref, freq_ref, cos_ref, sin_ref):
    # xyz: (bm, 3); freq: (3, F) per-axis frequency table (zero off-axis,
    # interleave-duplicated frequencies already baked in).
    xyz = xyz_ref[...]
    fr = freq_ref[...]
    ang = (xyz[:, 0:1] * fr[0:1, :]
           + xyz[:, 1:2] * fr[1:2, :]
           + xyz[:, 2:3] * fr[2:3, :])
    cos_ref[...] = jnp.cos(ang)
    sin_ref[...] = jnp.sin(ang)


def _fused_stack_kernel(*refs, num_layers, num_heads, use_rope, scale, f, hf):
    """A whole post-norm cross-attention + FFN LAYER STACK for one batch
    element.  Layers are unrolled inside the kernel; query activations stay
    resident in VMEM between layers.

    RoPE rotate-half is pre-folded into the projection weights:
      use_rope : Wq=(L,F,2F) -> [q | rot(q)],  Wkv=(L,F,3F) -> [k | rot(k) | v]
      no rope  : Wq=(L,F, F),                  Wkv=(L,F,2F) -> [k | v]
    All bias / LN vectors of a layer arrive packed in one (L, 1, TOTW) slab.
    """
    if use_rope:
        (xq_ref, xkv_ref, qcos_ref, qsin_ref, kcos_ref, ksin_ref,
         wq_ref, wkv_ref, wo_ref, w1_ref, w2_ref, vec_ref, o_ref) = refs
    else:
        (xq_ref, xkv_ref,
         wq_ref, wkv_ref, wo_ref, w1_ref, w2_ref, vec_ref, o_ref) = refs

    x = xq_ref[...]                      # (Nq, F)  f32
    xkv = xkv_ref[...]                   # (Nk, F)  f32
    dh = f // num_heads

    if use_rope:
        qcos, qsin = qcos_ref[...], qsin_ref[...]
        kcos, ksin = kcos_ref[...], ksin_ref[...]

    qw = 2 * f if use_rope else f
    kw = 3 * f if use_rope else 2 * f
    widths = (qw, kw, f, f, f, hf, f, f, f)
    offs = [0]
    for w in widths:
        offs.append(offs[-1] + w)

    for l in range(num_layers):          # unrolled (3 / 2 layers)
        vec = vec_ref[l]                 # (1, TOTW) f32, static lane slices
        bq = vec[:, offs[0]:offs[1]]
        bkv = vec[:, offs[1]:offs[2]]
        bo = vec[:, offs[2]:offs[3]]
        g1 = vec[:, offs[3]:offs[4]]
        be1 = vec[:, offs[4]:offs[5]]
        b1 = vec[:, offs[5]:offs[6]]
        b2 = vec[:, offs[6]:offs[7]]
        g2 = vec[:, offs[7]:offs[8]]
        be2 = vec[:, offs[8]:offs[9]]

        # fused projections (wide, lane-dense MXU passes, bf16 weights)
        qq = _mxu(x, wq_ref[l]) + bq                     # (Nq, qw)
        kk = _mxu(xkv, wkv_ref[l]) + bkv                 # (Nk, kw)
        if use_rope:
            q = qq[:, :f] * qcos + qq[:, f:] * qsin
            k = kk[:, :f] * kcos + kk[:, f:2 * f] * ksin
            v = kk[:, 2 * f:]
        else:
            q = qq
            k, v = kk[:, :f], kk[:, f:]

        qsb = (q * scale).astype(jnp.bfloat16)           # (Nq, F)
        ktb = k.T.astype(jnp.bfloat16)                   # (F, Nk) one transpose/layer
        vb = v.astype(jnp.bfloat16)                      # (Nk, F)

        # Multi-head attention; head outputs are concatenated and projected
        # with a single K=F matmul (no per-head out-proj accumulation).
        heads = []
        for h in range(num_heads):
            sl = slice(h * dh, (h + 1) * dh)
            s = jnp.dot(qsb[:, sl], ktb[sl, :],
                        preferred_element_type=jnp.float32)       # (Nq, Nk)
            s = s - jnp.max(s, axis=-1, keepdims=True)
            e = jnp.exp(s)
            p = e * pl.reciprocal(jnp.sum(e, axis=-1, keepdims=True),
                                  approx=True)
            heads.append(jnp.dot(p.astype(jnp.bfloat16), vb[:, sl],
                                 preferred_element_type=jnp.float32))
        attn_out = jnp.concatenate(heads, axis=-1)                # (Nq, F)

        # out-projection + residual + LayerNorm
        y = _layer_norm(x + _mxu(attn_out, wo_ref[l]) + bo, g1, be1)
        # FFN + residual + LayerNorm
        h1 = jnp.maximum(_mxu(y, w1_ref[l]) + b1, 0.0)
        z = y + _mxu(h1, w2_ref[l]) + b2
        x = _layer_norm(z, g2, be2)

    o_ref[...] = x.astype(o_ref.dtype)


# --------------------------------------------------------------------------
# pallas_call wrappers
# --------------------------------------------------------------------------

def linear(x, w, b):
    m, k = x.shape
    n = w.shape[1]
    bm = _pick_block_rows(m)
    return pl.pallas_call(
        _linear_kernel,
        out_shape=jax.ShapeDtypeStruct((m, n), jnp.float32),
        grid=(m // bm,),
        in_specs=[pl.BlockSpec((bm, k), lambda i: (i, 0)),
                  pl.BlockSpec((k, n), lambda i: (0, 0)),
                  pl.BlockSpec((1, n), lambda i: (0, 0))],
        out_specs=pl.BlockSpec((bm, n), lambda i: (i, 0)),
        compiler_params=pltpu.CompilerParams(
            dimension_semantics=("parallel",),
            vmem_limit_bytes=_VMEM_LIMIT),
    )(x, w, b)


def _rotary_freq_table(feature_dim):
    f = feature_dim
    d_axis = f // 3
    freq = np.exp(np.arange(0, d_axis, 2, dtype=np.float32)
                  * (-math.log(10000.0) / d_axis))            # (F//6,)
    div_full = np.tile(np.repeat(freq, 2), 3)                  # (F,) dup'd pairs
    sel = (np.arange(f)[None, :] // d_axis
           == np.arange(3)[:, None]).astype(np.float32)        # (3, F) one-hot
    return jnp.asarray(sel * div_full[None, :])


def rotary_pe_3d_cs(xyz, feature_dim):
    """RotaryPositionEncoding3D, lane-dense: returns (cos, sin), each (B,N,F)."""
    b, n = xyz.shape[0], xyz.shape[1]
    f = feature_dim
    m = b * n
    xyz_flat = xyz[..., :3].reshape(m, 3).astype(jnp.float32)
    bm = _pick_block_rows(m)
    cos, sin = pl.pallas_call(
        _rotary3d_kernel,
        out_shape=(jax.ShapeDtypeStruct((m, f), jnp.float32),
                   jax.ShapeDtypeStruct((m, f), jnp.float32)),
        grid=(m // bm,),
        in_specs=[pl.BlockSpec((bm, 3), lambda i: (i, 0)),
                  pl.BlockSpec((3, f), lambda i: (0, 0))],
        out_specs=(pl.BlockSpec((bm, f), lambda i: (i, 0)),
                   pl.BlockSpec((bm, f), lambda i: (i, 0))),
        compiler_params=pltpu.CompilerParams(
            dimension_semantics=("parallel",),
            vmem_limit_bytes=_VMEM_LIMIT),
    )(xyz_flat, _rotary_freq_table(f))
    return cos.reshape(b, n, f), sin.reshape(b, n, f)


def rotary_pe_3d(xyz, feature_dim):
    """API-boundary form: (B, N, 3+) -> (B, N, F, 2), [...,0]=cos [...,1]=sin."""
    cos, sin = rotary_pe_3d_cs(xyz, feature_dim)
    return jnp.stack([cos, sin], axis=-1)


def fused_attn_ffw_stack(stack, q_feats, kv_feats, q_cos=None, q_sin=None,
                         k_cos=None, k_sin=None, *, num_heads):
    """Whole layer stack (cross-attn(+RoPE) + out-proj + res LN + FFN + res LN,
    times num_layers) in ONE pallas_call, grid over the batch dimension."""
    bsz, nq, f = q_feats.shape
    nk = kv_feats.shape[1]
    use_rope = stack['use_rope']
    num_layers = stack['Wq'].shape[0]
    hf = stack['W1'].shape[2]

    act_ops = [q_feats, kv_feats]
    if use_rope:
        act_ops += [q_cos, q_sin, k_cos, k_sin]
    w_ops = [stack['Wq'], stack['Wkv'], stack['Wo'],
             stack['W1'], stack['W2'], stack['vec']]

    def act_spec(n):
        return pl.BlockSpec((None, n, f), lambda b: (b, 0, 0))

    in_specs = [act_spec(nq), act_spec(nk)]
    if use_rope:
        in_specs += [act_spec(nq), act_spec(nq), act_spec(nk), act_spec(nk)]
    in_specs += [pl.BlockSpec(w.shape, lambda b, nd=w.ndim: (0,) * nd)
                 for w in w_ops]

    kernel = functools.partial(
        _fused_stack_kernel, num_layers=num_layers, num_heads=num_heads,
        use_rope=use_rope, scale=float((f // num_heads) ** -0.5), f=f, hf=hf)

    return pl.pallas_call(
        kernel,
        out_shape=jax.ShapeDtypeStruct((bsz, nq, f), jnp.float32),
        grid=(bsz,),
        in_specs=in_specs,
        out_specs=pl.BlockSpec((None, nq, f), lambda b: (b, 0, 0)),
        compiler_params=pltpu.CompilerParams(
            dimension_semantics=("parallel",),   # v7x: shard batch over 2 TCs
            vmem_limit_bytes=_VMEM_LIMIT),
    )(*act_ops, *w_ops)


# --------------------------------------------------------------------------
# Encoder (Pallas version)
# --------------------------------------------------------------------------

class EncoderPallas:
    """Pallas port of the compute paths of diffuser_actor Encoder.

    # TODO(synk): encode_images (frozen pretrained CLIP/ResNet backbone +
    # FeaturePyramidNetwork + bilinear interpolation) is not reproducible
    # in-script without the pretrained checkpoint; it is not implemented.
    """

    def __init__(self, key, embedding_dim=48, nhist=3, num_attn_heads=8,
                 num_gripper_layers=3, num_vis_ins_attn_layers=2,
                 fps_subsampling_factor=5, instr_dim=512):
        assert embedding_dim % 6 == 0
        assert embedding_dim % num_attn_heads == 0
        self.F = embedding_dim
        self.H = num_attn_heads
        self.fps_subsampling_factor = fps_subsampling_factor

        keys = iter(jax.random.split(key, 512))

        def nrm(shape, scale=0.02):
            return scale * jax.random.normal(next(keys), shape, dtype=jnp.float32)

        f = embedding_dim
        self.curr_gripper_embed = nrm((nhist, f), 1.0)   # nn.Embedding(nhist, F)
        self.goal_gripper_embed = nrm((1, f), 1.0)       # nn.Embedding(1, F)
        self.instr_W = nrm((instr_dim, f)).astype(jnp.bfloat16)  # nn.Linear(512,F)
        self.instr_b = jnp.zeros((1, f), jnp.float32)

        P = make_pair_swap(f)  # RoPE rotate-half, folded into Q/K projections

        def rope_layer(hf):
            Wq, Wk, Wv = nrm((f, f)), nrm((f, f)), nrm((f, f))
            bq, bk, bv = nrm((f,)), nrm((f,)), nrm((f,))
            return dict(
                Wq=jnp.concatenate([Wq, Wq @ P], axis=1),        # (F, 2F)
                Wkv=jnp.concatenate([Wk, Wk @ P, Wv], axis=1),   # (F, 3F)
                Wo=nrm((f, f)), W1=nrm((f, hf)), W2=nrm((hf, f)),
                vec=jnp.concatenate([
                    jnp.concatenate([bq, bq @ P]),               # bq2   (2F)
                    jnp.concatenate([bk, bk @ P, bv]),           # bkv3  (3F)
                    nrm((f,)),                                   # bo
                    jnp.ones((f,), jnp.float32),                 # ln1_g
                    jnp.zeros((f,), jnp.float32),                # ln1_b
                    nrm((hf,)),                                  # b1
                    nrm((f,)),                                   # b2
                    jnp.ones((f,), jnp.float32),                 # ln2_g
                    jnp.zeros((f,), jnp.float32)]),              # ln2_b
            )

        def plain_layer(hf):
            Wq, Wk, Wv = nrm((f, f)), nrm((f, f)), nrm((f, f))
            bq, bk, bv = nrm((f,)), nrm((f,)), nrm((f,))
            return dict(
                Wq=Wq,                                           # (F, F)
                Wkv=jnp.concatenate([Wk, Wv], axis=1),           # (F, 2F)
                Wo=nrm((f, f)), W1=nrm((f, hf)), W2=nrm((hf, f)),
                vec=jnp.concatenate([
                    bq,                                          # bq    (F)
                    jnp.concatenate([bk, bv]),                   # bkv   (2F)
                    nrm((f,)),                                   # bo
                    jnp.ones((f,), jnp.float32),                 # ln1_g
                    jnp.zeros((f,), jnp.float32),                # ln1_b
                    nrm((hf,)),                                  # b1
                    nrm((f,)),                                   # b2
                    jnp.ones((f,), jnp.float32),                 # ln2_g
                    jnp.zeros((f,), jnp.float32)]),              # ln2_b
            )

        def stack_layers(layers, use_rope):
            st = {name: jnp.stack([lyr[name] for lyr in layers], axis=0)
                  for name in layers[0]}
            for name in ('Wq', 'Wkv', 'Wo', 'W1', 'W2'):
                st[name] = st[name].astype(jnp.bfloat16)         # pre-cast once
            st['vec'] = st['vec'][:, None, :].astype(jnp.float32)  # (L,1,TOTW)
            st['use_rope'] = use_rope
            return st

        # FFWRelativeCrossAttentionModule(F, H, num_layers=3, use_adaln=False)
        self.gripper_stack = stack_layers(
            [rope_layer(f) for _ in range(num_gripper_layers)], True)
        # ParallelAttention cross-attention stack (seq1 -> seq2), 2 layers.
        # TODO(synk): exact ParallelAttention internals (dropout placement,
        # FFN width) are approximated with a standard post-norm block.
        self.vl_stack = stack_layers(
            [plain_layer(4 * f) for _ in range(num_vis_ins_attn_layers)], False)

    # -- Encoder methods ----------------------------------------------------

    def _encode_gripper(self, gripper, gripper_embed, context_feats, context,
                        context_cs=None):
        bsz, npt = gripper.shape[0], gripper.shape[1]
        q_feats = jnp.broadcast_to(gripper_embed[None], (bsz, npt, self.F))
        q_cos, q_sin = rotary_pe_3d_cs(gripper[..., :3], self.F)
        if context_cs is None:
            context_cs = rotary_pe_3d_cs(context, self.F)
        k_cos, k_sin = context_cs
        x = fused_attn_ffw_stack(self.gripper_stack, q_feats, context_feats,
                                 q_cos, q_sin, k_cos, k_sin, num_heads=self.H)
        return x, jnp.stack([q_cos, q_sin], axis=-1)

    def encode_curr_gripper(self, curr_gripper, context_feats, context,
                            context_cs=None):
        return self._encode_gripper(curr_gripper, self.curr_gripper_embed,
                                    context_feats, context, context_cs)

    def encode_goal_gripper(self, goal_gripper, context_feats, context,
                            context_cs=None):
        return self._encode_gripper(goal_gripper[:, None],
                                    self.goal_gripper_embed,
                                    context_feats, context, context_cs)

    def encode_grippers(self, curr_gripper, goal_gripper, context_feats,
                        context, context_cs=None):
        """curr + goal gripper queries concatenated into ONE pass through the
        shared gripper stack (exact: cross-attn has no query-query coupling,
        FFN/LN are per-token)."""
        bsz, nhist = curr_gripper.shape[0], curr_gripper.shape[1]
        q_xyz = jnp.concatenate(
            [curr_gripper[..., :3], goal_gripper[:, None, :3]], axis=1)
        q_feats = jnp.concatenate([
            jnp.broadcast_to(self.curr_gripper_embed[None],
                             (bsz, nhist, self.F)),
            jnp.broadcast_to(self.goal_gripper_embed[None], (bsz, 1, self.F))],
            axis=1)                                            # (B, nhist+1, F)
        q_cos, q_sin = rotary_pe_3d_cs(q_xyz, self.F)
        if context_cs is None:
            context_cs = rotary_pe_3d_cs(context, self.F)
        k_cos, k_sin = context_cs
        x = fused_attn_ffw_stack(self.gripper_stack, q_feats, context_feats,
                                 q_cos, q_sin, k_cos, k_sin, num_heads=self.H)
        pos = jnp.stack([q_cos, q_sin], axis=-1)   # API-boundary stack only
        return (x[:, :nhist], pos[:, :nhist], x[:, nhist:], pos[:, nhist:])

    def encode_instruction(self, instruction):
        bsz, length, d = instruction.shape
        feats = linear(instruction.reshape(bsz * length, d),
                       self.instr_W, self.instr_b).reshape(bsz, length, self.F)
        # rotary PE of the all-zeros dummy is a compile-time constant:
        # cos = 1, sin = 0 (no kernel call).
        ones = jnp.ones((bsz, length, self.F), jnp.float32)
        zeros = jnp.zeros((bsz, length, self.F), jnp.float32)
        return feats, jnp.stack([ones, zeros], axis=-1)

    def vision_language_attention(self, feats, instr_feats):
        return fused_attn_ffw_stack(self.vl_stack, feats, instr_feats,
                                    num_heads=self.H)

    def run_fps(self, context_features, context_pos):
        # context_features: (npts, B, C); context_pos: (B, npts, F, 2)
        # TODO(synk): farthest_point_sample is a sequential data-dependent
        # argmax/gather loop; kept in plain JAX (fine at small npts).
        npts, bsz, ch = context_features.shape
        n_sample = max(1, npts // self.fps_subsampling_factor)
        feats_b = jnp.transpose(context_features, (1, 0, 2))   # (B, npts, C)

        def fps_one(x):
            def body(i, state):
                dists, inds = state
                last = x[inds[i - 1]]
                d = jnp.sum((x - last) ** 2, axis=-1)
                dists = jnp.minimum(dists, d)
                inds = inds.at[i].set(jnp.argmax(dists).astype(jnp.int32))
                return dists, inds
            dists0 = jnp.full((npts,), jnp.inf, jnp.float32)
            inds0 = jnp.zeros((n_sample,), jnp.int32)
            _, inds = jax.lax.fori_loop(1, n_sample, body, (dists0, inds0))
            return inds

        sampled_inds = jax.vmap(fps_one)(feats_b)                      # (B, n)
        sampled_feats = jnp.take_along_axis(feats_b, sampled_inds[..., None],
                                            axis=1)
        sampled_feats = jnp.transpose(sampled_feats, (1, 0, 2))        # (n, B, C)
        sampled_pos = jnp.take_along_axis(
            context_pos, sampled_inds[:, :, None, None], axis=1)       # (B,n,F,2)
        return sampled_feats, sampled_pos


# --------------------------------------------------------------------------
# Main
# --------------------------------------------------------------------------

if __name__ == "__main__":
    key = jax.random.PRNGKey(0)
    F = 48          # embedding_dim (divisible by 6 and by num heads)
    B = 2
    NHIST = 3
    L_INSTR = 8     # instruction tokens
    NPT_CTX = 16    # context points
    INSTR_DIM = 512

    k_par, k1, k2, k3, k4, k5 = jax.random.split(key, 6)
    enc = EncoderPallas(k_par, embedding_dim=F, nhist=NHIST, num_attn_heads=8,
                        num_gripper_layers=3, num_vis_ins_attn_layers=2,
                        fps_subsampling_factor=5, instr_dim=INSTR_DIM)

    curr_gripper = jax.random.normal(k1, (B, NHIST, 7), jnp.float32)   # (B,nhist,3+)
    goal_gripper = jax.random.normal(k2, (B, 7), jnp.float32)          # (B, 3+)
    context_feats = jax.random.normal(k3, (B, NPT_CTX, F), jnp.float32)
    context = jax.random.normal(k4, (B, NPT_CTX, 3), jnp.float32)
    instruction = jax.random.normal(k5, (B, L_INSTR, INSTR_DIM), jnp.float32)

    # context rotary PE computed once (lane-dense cos/sin) and reused by the
    # gripper stack; stacked form only built for the FPS / API boundary.
    ctx_cos, ctx_sin = rotary_pe_3d_cs(context, F)
    context_pos = jnp.stack([ctx_cos, ctx_sin], axis=-1)               # (B,N,F,2)

    instr_feats, instr_pos = enc.encode_instruction(instruction)
    cg_feats, cg_pos, gg_feats, gg_pos = enc.encode_grippers(
        curr_gripper, goal_gripper, context_feats, context, (ctx_cos, ctx_sin))
    vl_feats = enc.vision_language_attention(context_feats, instr_feats)

    ctx_feats_nbc = jnp.transpose(context_feats, (1, 0, 2))            # (npts,B,C)
    fps_feats, fps_pos = enc.run_fps(ctx_feats_nbc, context_pos)

    jax.block_until_ready((instr_feats, instr_pos, cg_feats, cg_pos,
                           gg_feats, gg_pos, vl_feats, fps_feats, fps_pos))

    # light sanity checks on shapes
    assert instr_feats.shape == (B, L_INSTR, F)
    assert instr_pos.shape == (B, L_INSTR, F, 2)
    assert cg_feats.shape == (B, NHIST, F) and cg_pos.shape == (B, NHIST, F, 2)
    assert gg_feats.shape == (B, 1, F) and gg_pos.shape == (B, 1, F, 2)
    assert vl_feats.shape == (B, NPT_CTX, F)
    assert fps_feats.shape == (NPT_CTX // 5, B, F)
    assert fps_pos.shape == (B, NPT_CTX // 5, F, 2)

    print("KERNEL_OK")
</pallas_src>

<mosaic_0001>
module attributes {stable_mosaic.version = 11 : i64} {
  func.func @_rotary3d_kernel(%arg0: i32, %arg1: memref<32x3xf32, #tpu.memory_space<vmem>>, %arg2: memref<3x48xf32, #tpu.memory_space<vmem>>, %arg3: memref<32x48xf32, #tpu.memory_space<vmem>>, %arg4: memref<32x48xf32, #tpu.memory_space<vmem>>) attributes {dimension_semantics = [#tpu.dimension_semantics<parallel>], iteration_bounds = array<i64: 1>, scalar_prefetch = 0 : i64, scratch_operands = 0 : i64, tpu.core_type = #tpu.core_type<tc>, window_params = [{transform_indices = @transform_0, window_bounds = array<i64: 32, 3>}, {pipeline_mode = #tpu.pipeline_mode<synchronous>, transform_indices = @transform_1, window_bounds = array<i64: 3, 48>}, {transform_indices = @transform_2, window_bounds = array<i64: 32, 48>}, {transform_indices = @transform_3, window_bounds = array<i64: 32, 48>}]} {
    %c0 = arith.constant 0 : index
    %c0_0 = arith.constant 0 : index
    %0 = vector.load %arg1[%c0, %c0_0] : memref<32x3xf32, #tpu.memory_space<vmem>>, vector<32x3xf32>
    %c0_1 = arith.constant 0 : index
    %c0_2 = arith.constant 0 : index
    %1 = vector.load %arg2[%c0_1, %c0_2] : memref<3x48xf32, #tpu.memory_space<vmem>>, vector<3x48xf32>
    %2 = vector.extract_strided_slice %0 {offsets = [0, 0], sizes = [32, 1], strides = [1, 1]} : vector<32x3xf32> to vector<32x1xf32>
    %3 = vector.extract_strided_slice %1 {offsets = [0, 0], sizes = [1, 48], strides = [1, 1]} : vector<3x48xf32> to vector<1x48xf32>
    %4 = vector.broadcast %2 : vector<32x1xf32> to vector<32x48xf32>
    %5 = vector.broadcast %3 : vector<1x48xf32> to vector<32x48xf32>
    %6 = arith.mulf %4, %5 : vector<32x48xf32>
    %7 = vector.extract_strided_slice %0 {offsets = [0, 1], sizes = [32, 1], strides = [1, 1]} : vector<32x3xf32> to vector<32x1xf32>
    %8 = vector.extract_strided_slice %1 {offsets = [1, 0], sizes = [1, 48], strides = [1, 1]} : vector<3x48xf32> to vector<1x48xf32>
    %9 = vector.broadcast %7 : vector<32x1xf32> to vector<32x48xf32>
    %10 = vector.broadcast %8 : vector<1x48xf32> to vector<32x48xf32>
    %11 = arith.mulf %9, %10 : vector<32x48xf32>
    %12 = arith.addf %6, %11 : vector<32x48xf32>
    %13 = vector.extract_strided_slice %0 {offsets = [0, 2], sizes = [32, 1], strides = [1, 1]} : vector<32x3xf32> to vector<32x1xf32>
    %14 = vector.extract_strided_slice %1 {offsets = [2, 0], sizes = [1, 48], strides = [1, 1]} : vector<3x48xf32> to vector<1x48xf32>
    %15 = vector.broadcast %13 : vector<32x1xf32> to vector<32x48xf32>
    %16 = vector.broadcast %14 : vector<1x48xf32> to vector<32x48xf32>
    %17 = arith.mulf %15, %16 : vector<32x48xf32>
    %18 = arith.addf %12, %17 : vector<32x48xf32>
    %19 = math.cos %18 : vector<32x48xf32>
    %c0_3 = arith.constant 0 : index
    %c0_4 = arith.constant 0 : index
    %20 = vector.load %arg3[%c0_3, %c0_4] : memref<32x48xf32, #tpu.memory_space<vmem>>, vector<32x48xf32>
    tpu.vector_store %arg3[%c0_3, %c0_4], %19 {strides = array<i32>} : memref<32x48xf32, #tpu.memory_space<vmem>>, vector<32x48xf32>,
    %21 = math.sin %18 : vector<32x48xf32>
    %c0_5 = arith.constant 0 : index
    %c0_6 = arith.constant 0 : index
    %22 = vector.load %arg4[%c0_5, %c0_6] : memref<32x48xf32, #tpu.memory_space<vmem>>, vector<32x48xf32>
    tpu.vector_store %arg4[%c0_5, %c0_6], %21 {strides = array<i32>} : memref<32x48xf32, #tpu.memory_space<vmem>>, vector<32x48xf32>,
    return
  }
  func.func @transform_0(%arg0: i32) -> (i32, i32) {
    %c0_i32 = arith.constant 0 : i32
    %c0_i32_0 = arith.constant 0 : i32
    return %arg0, %c0_i32 : i32, i32
  }
  func.func @transform_1(%arg0: i32) -> (i32, i32) {
    %c0_i32 = arith.constant 0 : i32
    %c0_i32_0 = arith.constant 0 : i32
    %c0_i32_1 = arith.constant 0 : i32
    return %c0_i32, %c0_i32_0 : i32, i32
  }
  func.func @transform_2(%arg0: i32) -> (i32, i32) {
    %c0_i32 = arith.constant 0 : i32
    %c0_i32_0 = arith.constant 0 : i32
    return %arg0, %c0_i32 : i32, i32
  }
  func.func @transform_3(%arg0: i32) -> (i32, i32) {
    %c0_i32 = arith.constant 0 : i32
    %c0_i32_0 = arith.constant 0 : i32
    return %arg0, %c0_i32 : i32, i32
  }
}

</mosaic_0001>

<bundles_post_ra>
// kernel: tpu_custom_call.1
= control target key start
LH: loop header
LB: loop body
LE: loop exit
PB: predicated region body
PF: predicated region fallthrough
CT: control target
= control target key end

     0   :  { %9 = vsyncpa [#allocation3], 0  ;;  %v1473_v2 = vmov 0   ;;  %s1980_s0 = inlined_call_operand.vmem [shape: f32[32,3], index: 0, kind: input, shape index: {}]   ;;  %s1981_s1 = inlined_call_operand.vmem [shape: f32[3,48], index: 1, kind: input, shape index: {}]   ;;  %s1982_s2 = inlined_call_operand.hbm [shape: f32[32,48], index: 2, kind: output, shape index: {0}]   ;;  %s1983_s3 = inlined_call_operand.hbm [shape: f32[32,48], index: 3, kind: output, shape index: {1}]  }
   0x1   :  { %v17_v0 = vld [vmem:[%s1980_s0 + $0x10] sm:$0xff]  ;;  %v15_v1 = vld [vmem:[%s1980_s0] sm:$0xff]  ;;  %1414 = vset.pattern.permute.xlu1 %v1473_v2  ;;  %1413 = vset.pattern.permute.xlu0 %v1473_v2 }
   0x2   :  { %10 = vsyncpa [#allocation5], 0  ;;  %32 = vperm.xlu1 %1414, %v17_v0   ;;  %22 = vperm.xlu0 %1413, %v15_v1   ;;  %v1474_v3 = vmov 1   ;;  %v18_v4 = vld [vmem:[%s1980_s0 + $0x18] sm:$0xff]  ;;  %v16_v5 = vld [vmem:[%s1980_s0 + $0x8] sm:$0xff]  ;;  %v1475_v6 = vmov 2  }
   0x3   :  { %1415 = vset.pattern.permute.xlu2 %v1474_v3  ;;  %v19_v8 = vld [vmem:[%s1981_s1] sm:$0x7]  ;;  %v1476_v45 = vmov 683565275   ;;  %v1477_v47 = vmov 2475754826  }
   0x4   :  { %46 = vperm.xlu2 %1415, %v15_v1   ;;  %v61_v9 = vperm.slane %v19_v8, 1  ;;  %v40_v12 = vperm.slane %v19_v8, 0  ;;  %v1523_v13 = vperm.slane %v19_v8, 2  ;;  %v1478_v51 = vmov 2131351028   ;;  %s1482_s0 = smov [#allocation4]  }
   0x5   :  { %v1479_v54 = vmov 2102212464   ;;  %v1480_v57 = vmov 920167782   ;;  %v1481_v60 = vmov 1326507024  }
   0x6   :  { %s1967_s1 = sshll.u32 %s1482_s0, 4  ;;  %s1359_s24 = sshll.u32 %s1983_s3, 4  ;;  %s1358_s1 = int_to_ptr.vmem [resolvable:$true] %s1967_s1  ;;  %s1360_s24 = int_to_ptr.hbm [resolvable:$true] %s1359_s24 }
   0x7   :  { %s1483_s25 = smov [#allocation2]   ;;  %s1346_s29 = sshll.u32 %s1982_s2, 4  ;;  %s1347_s29 = int_to_ptr.hbm [resolvable:$true] %s1346_s29 }
   0x8   :  { %s1344_s26 = sshll.u32 %s1483_s25, 4  ;;  %s1484_s2 = smov 128   ;;  %s1345_s26 = int_to_ptr.vmem [resolvable:$true] %s1344_s26 }
   0x9   :  { %s1485_s3 = smov 8  }
   0xa   :  { %37 = vperm.xlu1 %1414, %v18_v4   ;;  %27 = vperm.xlu0 %1413, %v16_v5  }
   0xc   :  { %50 = vperm.xlu2 %1415, %v16_v5  }
  0x12   :  { %1417 = vset.pattern.permute.xlu1 %v1474_v3  ;;  %1416 = vset.pattern.permute.xlu0 %v1474_v3 }
  0x13   :  { %58 = vperm.xlu1 %1417, %v18_v4   ;;  %54 = vperm.xlu0 %1416, %v17_v0  }
  0x14   :  { %1418 = vset.pattern.permute.xlu2 %v1475_v6 }
  0x15   :  { %71 = vperm.xlu2 %1418, %v15_v1  }
  0x1b   :  { %1419 = vset.pattern.permute.xlu1 %v1475_v6  ;;  %1420 = vset.pattern.permute.xlu0 %v1475_v6 }
  0x1c   :  { %75 = vperm.xlu1 %1419, %v16_v5   ;;  %83 = vperm.xlu0 %1420, %v18_v4  }
  0x1d   :  { %79 = vperm.xlu2 %1418, %v17_v0  }
  0x5e   :  { %v47_v7 = vpop.permute.xlu2 %46 }
  0x5f   :  { %v62_v15 = vmul.f32 %v61_v9, %v47_v7 }
  0x66   :  { %v51_v10 = vpop.permute.xlu2 %50 }
  0x67   :  { %v63_v11 = vmul.f32 %v61_v9, %v51_v10 }
  0x6f   :  { %v72_v14 = vpop.permute.xlu2 %71 }
  0x70   :  { %v87_v19 = vmul.f32 %v1523_v13, %v72_v14 }
  0x74   :  { %v33_v16 = vpop.permute.xlu1 %32  ;;  %v23_v17 = vpop.permute.xlu0 %22 }
  0x75   :  { %v41_v18 = vmul.f32 %v40_v12, %v23_v17  ;;  %v43_v38 = vmul.f32 %v40_v12, %v33_v16 }
  0x77   :  { %v66_v20 = vadd.f32 %v62_v15, %v41_v18  ;;  %v80_v33 = vpop.permute.xlu2 %79 }
  0x78   :  { %v89_v39 = vmul.f32 %v1523_v13, %v80_v33 }
  0x79   :  { %v1526_v21 = vadd.f32 %v87_v19, %v66_v20 }
  0x7b   :  { %v95_v22 = vand.u32 2147483647, %v1526_v21  ;;  %v98_v23 = vand.u32 2139095040, %v1526_v21 }
  0x7c   :  { %v38_v24 = vpop.permute.xlu1 %37  ;;  %v28_v25 = vpop.permute.xlu0 %27 }
  0x7d   :  { %v99_v26 = vshrl.u32 %v98_v23, 23  ;;  %v42_v27 = vmul.f32 %v40_v12, %v28_v25  ;;  %v102_v29 = vand.u32 8388607, %v95_v22  ;;  %v44_v42 = vmul.f32 %v40_v12, %v38_v24 }
  0x7f   :  { %v1376_v28 = vadd.s32 4294967169, %v99_v26  ;;  %v1532_v30 = vadd.f32 %v63_v11, %v42_v27  ;;  %v103_v32 = vor.u32 8388608, %v102_v29 }
  0x81   :  { %v105_v31 = vadd.s32 1, %v1376_v28  ;;  %v1535_v41 = vshll.u32 %v103_v32, 8 }
  0x83   :  { %vm106_vm0 = vcmp.gt.s32.totalorder %v105_v31, 0  ;;  %v144_v16 = vand.u32 65535, %v1535_v41  ;;  %v145_v17 = vshrl.u32 %v1535_v41, 16 }
  0x84   :  { %v107_v34 = vsel %vm106_vm0, %v105_v31, 0  ;;  %vm97_vm0 = vcmp.lt.s32.totalorder %v1526_v21, 0 }
  0x85   :  { %v109_v35 = vand.u32 31, %v107_v34  ;;  %v59_v36 = vpop.permute.xlu1 %58  ;;  %v55_v37 = vpop.permute.xlu0 %54  ;;  %v1537_v44 = vshrl.u32 %v107_v34, 5 }
  0x86   :  { %v65_v43 = vmul.f32 %v61_v9, %v59_v36  ;;  %v64_v49 = vmul.f32 %v61_v9, %v55_v37 }
  0x87   :  { %v110_v40 = vsub.s32 32, %v109_v35  ;;  %v112_v46 = vshll.u32 %v1476_v45, %v109_v35  ;;  %v115_v48 = vshll.u32 %v1477_v47, %v109_v35  ;;  %v118_v53 = vshll.u32 %v1478_v51, %v109_v35 }
  0x88   :  { %v121_v56 = vshll.u32 %v1479_v54, %v109_v35  ;;  %v124_v59 = vshll.u32 %v1480_v57, %v109_v35  ;;  %v1549_v1 = vadd.f32 %v65_v43, %v44_v42  ;;  %vm127_vm1 = vcmp.lt.s32.totalorder %v1537_v44, 1 }
  0x89   :  { %v113_v50 = vshrl.u32 %v1477_v47, %v110_v40  ;;  %v116_v52 = vshrl.u32 %v1478_v51, %v110_v40  ;;  %v119_v55 = vshrl.u32 %v1479_v54, %v110_v40  ;;  %v122_v58 = vshrl.u32 %v1480_v57, %v110_v40 }
  0x8a   :  { %v125_v61 = vshrl.u32 %v1481_v60, %v110_v40  ;;  %v68_v5 = vadd.f32 %v64_v49, %v43_v38  ;;  %vm130_vm2 = vcmp.lt.s32.totalorder %v1537_v44, 4  ;;  %vm129_vm3 = vcmp.lt.s32.totalorder %v1537_v44, 3 }
  0x8b   :  { %v114_v62 = vor.u32 %v113_v50, %v112_v46  ;;  %v117_v63 = vor.u32 %v116_v52, %v115_v48  ;;  %v120_v0 = vor.u32 %v119_v55, %v118_v53  ;;  %v123_v3 = vor.u32 %v122_v58, %v121_v56 }
  0x8c   :  { %v126_v4 = vor.u32 %v125_v61, %v124_v59  ;;  %vm128_vm4 = vcmp.lt.s32.totalorder %v1537_v44, 2  ;;  %v1567_v12 = vadd.f32 %v89_v39, %v68_v5  ;;  %v111_v24 = vshrl.u32 %v1476_v45, %v110_v40 }
  0x8d   :  { %v135_v6 = vsel %vm127_vm1, %v114_v62, %v117_v63  ;;  %v139_v7 = vsel %vm127_vm1, %v117_v63, %v120_v0  ;;  %v136_v8 = vsel %vm130_vm2, %v123_v3, 920167782  ;;  %v132_v25 = vsel %vm130_vm2, %v120_v0, 2102212464 }
  0x8e   :  { %v140_v9 = vsel %vm130_vm2, %v126_v4, 1326507024  ;;  %v137_v10 = vsel %vm129_vm3, %v120_v0, %v136_v8  ;;  %v406_v28 = vand.u32 2139095040, %v1567_v12  ;;  %v131_v29 = vsel %vm127_vm1, %v111_v24, %v114_v62 }
  0x8f   :  { %v141_v11 = vsel %vm129_vm3, %v123_v3, %v140_v9  ;;  %v138_v14 = vsel %vm128_vm4, %v135_v6, %v137_v10  ;;  %v133_v33 = vsel %vm129_vm3, %v117_v63, %v132_v25  ;;  %v403_v36 = vand.u32 2147483647, %v1567_v12 }
  0x90   :  { %v142_v15 = vsel %vm128_vm4, %v139_v7, %v141_v11  ;;  %v168_v20 = vand.u32 65535, %v138_v14  ;;  %v169_v23 = vshrl.u32 %v138_v14, 16  ;;  %v407_v46 = vshrl.u32 %v406_v28, 23 }
  0x91   :  { %v146_v18 = vand.u32 65535, %v142_v15  ;;  %v147_v19 = vshrl.u32 %v142_v15, 16  ;;  %v134_v0 = vsel %vm128_vm4, %v131_v29, %v133_v33  ;;  %v410_v7 = vand.u32 8388607, %v403_v36  ;;  %v76_v29 = vpop.permute.xlu1 %75 }
  0x92   :  { %v171_v31 = vmul.u32 %v169_v23, %v144_v16  ;;  %v172_v32 = vmul.u32 %v168_v20, %v145_v17  ;;  %v170_v38 = vmul.u32 %v168_v20, %v144_v16  ;;  %v173_v39 = vmul.u32 %v169_v23, %v145_v17 }
  0x93   :  { %v149_v26 = vmul.u32 %v147_v19, %v144_v16  ;;  %v150_v27 = vmul.u32 %v146_v18, %v145_v17  ;;  %v148_v34 = vmul.u32 %v146_v18, %v144_v16  ;;  %v151_v37 = vmul.u32 %v147_v19, %v145_v17 }
  0x94   :  { %v174_v40 = vshll.u32 %v171_v31, 16  ;;  %v176_v49 = vshll.u32 %v172_v32, 16  ;;  %v1382_v55 = vadd.s32 4294967169, %v407_v46  ;;  %v175_v3 = vshrl.u32 %v171_v31, 16 }
  0x95   :  { %v152_v35 = vshll.u32 %v149_v26, 16  ;;  %v154_v42 = vshll.u32 %v150_v27, 16  ;;  %v153_v59 = vshrl.u32 %v149_v26, 16  ;;  %v155_v5 = vshrl.u32 %v150_v27, 16 }
  0x96   :  { %vm178_vm6 = vc.u32 %v170_v38, %v174_v40  ;;  %v180_v50 = vadd.s32 %v174_v40, %v170_v38  ;;  %v413_v63 = vadd.s32 1, %v1382_v55  ;;  %v177_v8 = vshrl.u32 %v172_v32, 16 }
  0x97   :  { %vm156_vm5 = vc.u32 %v148_v34, %v152_v35  ;;  %v158_v43 = vadd.s32 %v152_v35, %v148_v34  ;;  %v179_v53 = vsel %vm178_vm6, 1, %v1473_v2  ;;  %v188_v17 = vmul.u32 %v1535_v41, %v134_v0 }
  0x98   :  { %v157_v48 = vsel %vm156_vm5, 1, %v1473_v2  ;;  %v181_v58 = vadd.s32 %v179_v53, %v173_v39  ;;  %vm182_vm8 = vc.u32 %v180_v50, %v176_v49  ;;  %vm414_vm9 = vcmp.gt.s32.totalorder %v413_v63, 0 }
  0x99   :  { %v159_v52 = vadd.s32 %v157_v48, %v151_v37  ;;  %vm160_vm7 = vc.u32 %v158_v43, %v154_v42  ;;  %v183_v62 = vsel %vm182_vm8, 1, %v1473_v2  ;;  %v415_v10 = vsel %vm414_vm9, %v413_v63, 0 }
  0x9a   :  { %v161_v56 = vsel %vm160_vm7, 1, %v1473_v2  ;;  %v185_v4 = vadd.s32 %v183_v62, %v181_v58  ;;  %v184_v14 = vadd.s32 %v180_v50, %v176_v49  ;;  %v417_v15 = vand.u32 31, %v415_v10 }
  0x9b   :  { %v163_v61 = vadd.s32 %v161_v56, %v159_v52  ;;  %v411_v44 = vor.u32 8388608, %v410_v7  ;;  %v1593_v18 = vshrl.u32 %v415_v10, 5  ;;  %v88_v43 = vmul.f32 %v1523_v13, %v76_v29 }
  0x9c   :  { %v186_v9 = vadd.s32 %v185_v4, %v175_v3  ;;  %v418_v19 = vsub.s32 32, %v417_v15  ;;  %v420_v23 = vshll.u32 %v1476_v45, %v417_v15  ;;  %v423_v24 = vshll.u32 %v1477_v47, %v417_v15 }
  0x9d   :  { %v164_v6 = vadd.s32 %v163_v61, %v153_v59  ;;  %v426_v25 = vshll.u32 %v1478_v51, %v417_v15  ;;  %v429_v41 = vshll.u32 %v1479_v54, %v417_v15  ;;  %v432_v33 = vshll.u32 %v1480_v57, %v417_v15 }
  0x9e   :  { %v187_v16 = vadd.s32 %v186_v9, %v177_v8  ;;  %v421_v26 = vshrl.u32 %v1477_v47, %v418_v19  ;;  %v424_v27 = vshrl.u32 %v1478_v51, %v418_v19  ;;  %v427_v28 = vshrl.u32 %v1479_v54, %v418_v19 }
  0x9f   :  { %v165_v11 = vadd.s32 %v164_v6, %v155_v5  ;;  %v430_v32 = vshrl.u32 %v1480_v57, %v418_v19  ;;  %v433_v34 = vshrl.u32 %v1481_v60, %v418_v19  ;;  %vm435_vm11 = vcmp.lt.s32.totalorder %v1593_v18, 1 }
  0xa0   :  { %v191_v20 = vadd.s32 1, %v187_v16  ;;  %v422_v37 = vor.u32 %v421_v26, %v420_v23  ;;  %v1605_v38 = vor.u32 %v424_v27, %v423_v24  ;;  %v428_v39 = vor.u32 %v427_v28, %v426_v25 }
  0xa1   :  { %vm190_vm10 = vc.u32 %v165_v11, %v184_v14  ;;  %v431_v40 = vor.u32 %v430_v32, %v429_v41  ;;  %v434_v42 = vor.u32 %v433_v34, %v432_v33  ;;  %vm438_vm12 = vcmp.lt.s32.totalorder %v1593_v18, 4 }
  0xa2   :  { %v192_v31 = vsel %vm190_vm10, %v191_v20, %v187_v16  ;;  %v1610_v48 = vshll.u32 %v411_v44, 8  ;;  %vm437_vm13 = vcmp.lt.s32.totalorder %v1593_v18, 3  ;;  %v443_v49 = vsel %vm435_vm11, %v422_v37, %v1605_v38 }
  0xa3   :  { %v193_v35 = vadd.s32 %v192_v31, %v188_v17  ;;  %v444_v50 = vsel %vm438_vm12, %v431_v40, 920167782  ;;  %v447_v52 = vsel %vm435_vm11, %v1605_v38, %v428_v39  ;;  %v448_v56 = vsel %vm438_vm12, %v434_v42, 1326507024 }
  0xa4   :  { %v445_v55 = vsel %vm437_vm13, %v428_v39, %v444_v50  ;;  %vm436_vm14 = vcmp.lt.s32.totalorder %v1593_v18, 2  ;;  %v449_v58 = vsel %vm437_vm13, %v431_v40, %v448_v56  ;;  %v452_v63 = vand.u32 65535, %v1610_v48 }
  0xa5   :  { %v194_v46 = vadd.s32 536870912, %v193_v35  ;;  %v446_v61 = vsel %vm436_vm14, %v443_v49, %v445_v55  ;;  %v450_v62 = vsel %vm436_vm14, %v447_v52, %v449_v58  ;;  %v1637_v4 = vadd.f32 %v88_v43, %v1532_v30 }
  0xa6   :  { %v454_v0 = vand.u32 65535, %v450_v62  ;;  %v455_v3 = vshrl.u32 %v450_v62, 16  ;;  %v453_v6 = vshrl.u32 %v1610_v48, 16  ;;  %v419_v7 = vshrl.u32 %v1476_v45, %v418_v19 }
  0xa7   :  { %v1621_v53 = vshrl.u32 %v194_v46, 30  ;;  %v476_v9 = vand.u32 65535, %v446_v61  ;;  %v477_v16 = vshrl.u32 %v446_v61, 16  ;;  %v252_v20 = vand.u32 2139095040, %v1637_v4 }
  0xa8   :  { %v457_v8 = vmul.u32 %v455_v3, %v452_v63  ;;  %v458_v15 = vmul.u32 %v454_v0, %v453_v6  ;;  %v456_v17 = vmul.u32 %v454_v0, %v452_v63  ;;  %v189_v23 = vadd.s32 %v184_v14, %v165_v11 }
  0xa9   :  { %v196_v59 = vshll.u32 %v1621_v53, 30  ;;  %v439_v30 = vsel %vm435_vm11, %v419_v7, %v422_v37  ;;  %v440_v25 = vsel %vm438_vm12, %v428_v39, 2102212464  ;;  %v459_v26 = vmul.u32 %v455_v3, %v453_v6 }
  0xaa   :  { %v460_v44 = vshll.u32 %v457_v8, 16  ;;  %v480_v27 = vmul.u32 %v476_v9, %v453_v6  ;;  %v462_v28 = vshll.u32 %v458_v15, 16  ;;  %v479_v31 = vmul.u32 %v477_v16, %v452_v63 }
  0xab   :  { %v197_v5 = vsub.s32 %v193_v35, %v196_v59  ;;  %v219_v11 = vsub.s32 4, %v1621_v53  ;;  %v478_v14 = vmul.u32 %v476_v9, %v452_v63  ;;  %v253_v33 = vshrl.u32 %v252_v20, 23 }
  0xac   :  { %vm464_vm1 = vc.u32 %v456_v17, %v460_v44  ;;  %v466_v29 = vadd.s32 %v460_v44, %v456_v17  ;;  %v461_v34 = vshrl.u32 %v457_v8, 16  ;;  %v482_v37 = vshll.u32 %v479_v31, 16 }
  0xad   :  { %vm198_vm15 = vcmp.lt.s32.totalorder %v197_v5, 0  ;;  %v199_v10 = vsub.s32 0, %v197_v5  ;;  %v465_v41 = vsel %vm464_vm1, 1, %v1473_v2  ;;  %v481_v40 = vmul.u32 %v477_v16, %v453_v6 }
  0xae   :  { %v467_v35 = vadd.s32 %v465_v41, %v459_v26  ;;  %vm468_vm2 = vc.u32 %v466_v29, %v462_v28  ;;  %v484_v42 = vshll.u32 %v480_v27, 16  ;;  %vm486_vm4 = vc.u32 %v478_v14, %v482_v37 }
  0xaf   :  { %v200_v24 = vsel %vm198_vm15, %v199_v10, %v197_v5  ;;  %v469_v39 = vsel %vm468_vm2, 1, %v1473_v2  ;;  %v488_v49 = vadd.s32 %v482_v37, %v478_v14  ;;  %v463_v55 = vshrl.u32 %v458_v15, 16 }
  0xb0   :  { %v201_v19 = vclz %v200_v24  ;;  %v471_v46 = vadd.s32 %v469_v39, %v467_v35  ;;  %v487_v56 = vsel %vm486_vm4, 1, %v1473_v2  ;;  %v1379_v3 = vadd.s32 4294967169, %v253_v33 }
  0xb1   :  { %v489_v61 = vadd.s32 %v487_v56, %v481_v40  ;;  %vm490_vm5 = vc.u32 %v488_v49, %v484_v42  ;;  %v220_v6 = vsel %vm97_vm0, %v219_v11, %v1621_v53  ;;  %v441_v7 = vsel %vm437_vm13, %v1605_v38, %v440_v25 }
  0xb2   :  { %v1377_v32 = vadd.s32 4294967294, %v201_v19  ;;  %v472_v59 = vadd.s32 %v471_v46, %v461_v34  ;;  %v491_v0 = vsel %vm490_vm5, 1, %v1473_v2  ;;  %v483_v8 = vshrl.u32 %v479_v31, 16 }
  0xb3   :  { %v493_v9 = vadd.s32 %v491_v0, %v489_v61  ;;  %v259_v16 = vadd.s32 1, %v1379_v3  ;;  %vm1662_vm6 = vcmp.le.f32.partialorder %v95_v22, 0.7853982  ;;  %v485_v44 = vshrl.u32 %v480_v27, 16 }
  0xb4   :  { %vm1378_vm3 = vcmp.lt.s32.totalorder %v1377_v32, 0  ;;  %v1658_v15 = vadd.s32 %v472_v59, %v463_v55  ;;  %v249_v38 = vand.u32 2147483647, %v1637_v4  ;;  %v222_v24 = vsel %vm1662_vm6, 0, %v220_v6 }
  0xb5   :  { %v204_v43 = vsel %vm1378_vm3, 0, %v1377_v32  ;;  %v494_v20 = vadd.s32 %v493_v9, %v483_v8  ;;  %vm260_vm7 = vcmp.gt.s32.totalorder %v259_v16, 0  ;;  %v442_v25 = vsel %vm436_vm14, %v439_v30, %v441_v7 }
  0xb6   :  { %v205_v50 = vsub.s32 32, %v204_v43  ;;  %v209_v52 = vsub.s32 4294967266, %v204_v43  ;;  %v206_v58 = vshll.u32 %v197_v5, %v204_v43  ;;  %v261_v26 = vsel %vm260_vm7, %v259_v16, 0 }
  0xb7   :  { %v495_v19 = vadd.s32 %v494_v20, %v485_v44  ;;  %v263_v27 = vand.u32 31, %v261_v26  ;;  %v496_v31 = vmul.u32 %v1610_v48, %v442_v25  ;;  %v1678_v11 = vand.u32 3, %v222_v24 }
  0xb8   :  { %v207_v62 = vshrl.u32 %v189_v23, %v205_v50  ;;  %v210_v63 = vadd.s32 127, %v209_v52  ;;  %v1666_v23 = vadd.s32 %v488_v49, %v484_v42  ;;  %v256_v18 = vand.u32 8388607, %v249_v38 }
  0xb9   :  { %v499_v41 = vadd.s32 1, %v495_v19  ;;  %v1676_v32 = vsub.s32 32, %v263_v27  ;;  %v860_v33 = vadd.s32 3, %v222_v24  ;;  %v1682_v35 = vshrl.u32 %v261_v26, 5 }
  0xba   :  { %v208_v10 = vor.u32 %v207_v62, %v206_v58  ;;  %v211_v5 = vshll.u32 %v210_v63, 23  ;;  %vm498_vm8 = vc.u32 %v1658_v15, %v1666_v23  ;;  %v275_v46 = vshll.u32 %v1479_v54, %v263_v27 }
  0xbb   :  { %v500_v14 = vsel %vm498_vm8, %v499_v41, %v495_v19  ;;  %v270_v37 = vshrl.u32 %v1478_v51, %v1676_v32  ;;  %v273_v39 = vshrl.u32 %v1479_v54, %v1676_v32  ;;  %v276_v48 = vshrl.u32 %v1480_v57, %v1676_v32 }
  0xbc   :  { %v212_v53 = vor.u32 4788187, %v211_v5  ;;  %v215_v28 = vcvt.s32.f32 %v208_v10  ;;  %v501_v34 = vadd.s32 %v500_v14, %v496_v31  ;;  %v279_v40 = vshrl.u32 %v1481_v60, %v1676_v32  ;;  %v84_v10 = vpop.permute.xlu0 %83 }
  0xbd   :  { %v278_v49 = vshll.u32 %v1480_v57, %v263_v27  ;;  %v267_v52 = vshrl.u32 %v1477_v47, %v1676_v32  ;;  %v269_v55 = vshll.u32 %v1477_v47, %v263_v27  ;;  %v272_v56 = vshll.u32 %v1478_v51, %v263_v27 }
  0xbe   :  { %v213_v22 = vand.u32 2147483647, %v212_v53  ;;  %v502_v43 = vadd.s32 536870912, %v501_v34  ;;  %v277_v61 = vor.u32 %v276_v48, %v275_v46  ;;  %v257_v63 = vor.u32 8388608, %v256_v18 }
  0xbf   :  { %v280_v62 = vor.u32 %v279_v40, %v278_v49  ;;  %v266_v0 = vshll.u32 %v1476_v45, %v263_v27  ;;  %v1710_v3 = vor.u32 %v270_v37, %v269_v55  ;;  %v1712_v6 = vor.u32 %v273_v39, %v272_v56 }
  0xc0   :  { %v216_v29 = vmul.f32 %v215_v28, %v213_v22  ;;  %v1707_v59 = vshrl.u32 %v502_v43, 30  ;;  %vm284_vm9 = vcmp.lt.s32.totalorder %v1682_v35, 4  ;;  %vm281_vm10 = vcmp.lt.s32.totalorder %v1682_v35, 1 }
  0xc1   :  { %v1716_v5 = vor.u32 %v267_v52, %v266_v0  ;;  %vm283_vm11 = vcmp.lt.s32.totalorder %v1682_v35, 3  ;;  %v294_v16 = vsel %vm284_vm9, %v280_v62, 1326507024  ;;  %v290_v53 = vsel %vm284_vm9, %v277_v61, 920167782 }
  0xc2   :  { %v217_v30 = vxor.u32 2147483648, %v216_v29  ;;  %v504_v9 = vshll.u32 %v1707_v59, 30  ;;  %v1726_v24 = vand.u32 3, %v860_v33  ;;  %v293_v25 = vsel %vm281_vm10, %v1710_v3, %v1712_v6 }
  0xc3   :  { %v295_v19 = vsel %vm283_vm11, %v277_v61, %v294_v16  ;;  %v90_v26 = vmul.f32 %v1523_v13, %v84_v10  ;;  %vm282_vm13 = vcmp.lt.s32.totalorder %v1682_v35, 2  ;;  %v289_v41 = vsel %vm281_vm10, %v1716_v5, %v1710_v3 }
  0xc4   :  { %v218_v42 = vsel %vm97_vm0, %v217_v30, %v216_v29  ;;  %v1722_v20 = vsub.s32 %v501_v34, %v504_v9  ;;  %v291_v29 = vsel %vm283_vm11, %v1712_v6, %v290_v53  ;;  %v1745_v31 = vshll.u32 %v257_v63, 8 }
  0xc5   :  { %v1699_v50 = vsel %vm1662_vm6, %v1526_v21, %v218_v42  ;;  %v296_v30 = vsel %vm282_vm13, %v293_v25, %v295_v19  ;;  %vm241_vm14 = vcmp.eq.s32.totalorder %v1678_v11, 0  ;;  %vm244_vm15 = vcmp.eq.s32.totalorder %v1678_v11, 2 }
  0xc6   :  { %v223_v58 = vmul.f32 %v1699_v50, %v1699_v50  ;;  %vm506_vm12 = vcmp.lt.s32.totalorder %v1722_v20, 0  ;;  %v507_v27 = vsub.s32 0, %v1722_v20  ;;  %vm863_vm0 = vcmp.eq.s32.totalorder %v1726_v24, 0 }
  0xc7   :  { %vm866_vm1 = vcmp.eq.s32.totalorder %v1726_v24, 2  ;;  %vm711_vm2 = vcmask 392192   ;;  %vm240_vm3 = vcmp.lt.s32.totalorder %v1678_v11, 2  ;;  %vm862_vm4 = vcmp.lt.s32.totalorder %v1726_v24, 2 }
  0xc8   :  { %v224_v7 = vmul.f32 -0.001358992, %v223_v58  ;;  %v231_v8 = vmul.f32 -0.00019511016, %v223_v58  ;;  %v508_v18 = vsel %vm506_vm12, %v507_v27, %v1722_v20  ;;  %v1758_v39 = vsel %vm282_vm13, %v289_v41, %v291_v29 }
  0xc9   :  { %v509_v33 = vclz %v508_v18  ;;  %v300_v48 = vand.u32 65535, %v296_v30  ;;  %vm238_vm5 = vweird.f32 %v1526_v21  ;;  %v497_v40 = vadd.s32 %v1666_v23, %v1658_v15 }
  0xca   :  { %v225_v17 = vadd.f32 0.041655596, %v224_v7  ;;  %v232_v44 = vadd.f32 0.008332121, %v231_v8  ;;  %v298_v43 = vand.u32 65535, %v1745_v31  ;;  %v301_v46 = vshrl.u32 %v296_v30, 16 }
  0xcb   :  { %v1383_v42 = vadd.s32 4294967294, %v509_v33  ;;  %v299_v55 = vshrl.u32 %v1745_v31, 16  ;;  %v1766_v56 = vadd.f32 %v90_v26, %v1549_v1  ;;  %vm405_vm6 = vcmp.lt.s32.totalorder %v1567_v12, 0 }
  0xcc   :  { %v226_v22 = vmul.f32 %v225_v17, %v223_v58  ;;  %v233_v28 = vmul.f32 %v232_v44, %v223_v58  ;;  %v303_v61 = vmul.u32 %v301_v46, %v298_v43  ;;  %v322_v62 = vand.u32 65535, %v1758_v39 }
  0xcd   :  { %vm1384_vm7 = vcmp.lt.s32.totalorder %v1383_v42, 0  ;;  %v1772_v0 = vmul.u32 %v300_v48, %v299_v55  ;;  %v302_v9 = vmul.u32 %v300_v48, %v298_v43  ;;  %v323_v1 = vshrl.u32 %v1758_v39, 16 }
  0xce   :  { %v227_v13 = vadd.f32 -0.4999988, %v226_v22  ;;  %v234_v14 = vadd.f32 -0.16666654, %v233_v28  ;;  %v512_v63 = vsel %vm1384_vm7, 0, %v1383_v42  ;;  %v305_v44 = vmul.u32 %v301_v46, %v299_v55 }
  0xcf   :  { %v513_v7 = vsub.s32 32, %v512_v63  ;;  %v517_v8 = vsub.s32 4294967266, %v512_v63  ;;  %vm1777_vm8 = vcmp.le.f32.partialorder %v403_v36, 0.7853982  ;;  %v514_v17 = vshll.u32 %v1722_v20, %v512_v63 }
  0xd0   :  { %v228_v34 = vmul.f32 %v227_v13, %v223_v58  ;;  %v235_v37 = vmul.f32 %v234_v14, %v223_v58  ;;  %v527_v58 = vsub.s32 4, %v1707_v59  ;;  %v308_v28 = vshll.u32 %v1772_v0, 16 }
  0xd1   :  { %v515_v19 = vshrl.u32 %v497_v40, %v513_v7  ;;  %v518_v26 = vadd.s32 127, %v517_v8  ;;  %v557_v11 = vand.u32 2147483647, %v1766_v56  ;;  %v560_v24 = vand.u32 2139095040, %v1766_v56 }
  0xd2   :  { %v229_v49 = vadd.f32 1.0, %v228_v34  ;;  %v236_v52 = vadd.f32 1.0, %v235_v37  ;;  %v528_v37 = vsel %vm405_vm6, %v527_v58, %v1707_v59  ;;  %v325_v21 = vmul.u32 %v323_v1, %v298_v43 }
  0xd3   :  { %v516_v41 = vor.u32 %v515_v19, %v514_v17  ;;  %v519_v29 = vshll.u32 %v518_v26, 23  ;;  %v326_v39 = vmul.u32 %v322_v62, %v299_v55  ;;  %v265_v42 = vshrl.u32 %v1476_v45, %v1676_v32 }
  0xd4   :  { %v237_v15 = vmul.f32 %v236_v52, %v1699_v50  ;;  %v245_v23 = vxor.u32 2147483648, %v229_v49  ;;  %v306_v50 = vshll.u32 %v303_v61, 16  ;;  %v530_v59 = vsel %vm1777_vm8, 0, %v528_v37 }
  0xd5   :  { %v520_v33 = vor.u32 4788187, %v519_v29  ;;  %v523_v40 = vcvt.s32.f32 %v516_v41  ;;  %v307_v58 = vshrl.u32 %v303_v61, 16  ;;  %v561_v7 = vshrl.u32 %v560_v24, 23 }
  0xd6   :  { %v242_v10 = vxor.u32 2147483648, %v237_v15  ;;  %v246_v53 = vsel %vm244_vm15, %v245_v23, %v237_v15  ;;  %v868_v25 = vsel %vm866_vm1, %v245_v23, %v237_v15  ;;  %vm310_vm12 = vc.u32 %v302_v9, %v306_v50 }
  0xd7   :  { %v311_v18 = vsel %vm310_vm12, 1, %v1473_v2  ;;  %v312_v30 = vadd.s32 %v306_v50, %v302_v9  ;;  %v521_v48 = vand.u32 2147483647, %v520_v33  ;;  %v324_v15 = vmul.u32 %v322_v62, %v298_v43 }
  0xd8   :  { %v243_v22 = vsel %vm241_vm14, %v229_v49, %v242_v10  ;;  %v865_v36 = vsel %vm863_vm0, %v229_v49, %v242_v10  ;;  %v313_v34 = vadd.s32 %v311_v18, %v305_v44  ;;  %v286_v49 = vsel %vm284_vm9, %v1712_v6, 2102212464 }
  0xd9   :  { %v247_v20 = vsel %vm240_vm3, %v243_v22, %v246_v53  ;;  %v869_v27 = vsel %vm862_vm4, %v865_v36, %v868_v25  ;;  %vm314_vm14 = vc.u32 %v312_v30, %v308_v28  ;;  %v328_v23 = vshll.u32 %v325_v21, 16 }
  0xda   :  { %v248_v13 = vsel %vm238_vm5, nan, %v247_v20  ;;  %v870_v14 = vsel %vm238_vm5, nan, %v869_v27  ;;  %v315_v46 = vsel %vm314_vm14, 1, %v1473_v2  ;;  %v524_v63 = vmul.f32 %v523_v40, %v521_v48 }
  0xdb   :  { %1336 = vst.msk [vmem:[#allocation4] sm:$0xff] %vm711_vm2, %v870_v14  ;;  %v317_v52 = vadd.s32 %v315_v46, %v313_v34  ;;  %v327_v8 = vmul.u32 %v323_v1, %v299_v55  ;;  %v330_v9 = vshll.u32 %v326_v39, 16  ;;  %vm332_vm15 = vc.u32 %v324_v15, %v328_v23 }
  0xdc   :  { %712 = vst.msk [vmem:[#allocation2] sm:$0xff] %vm711_vm2, %v248_v13  ;;  %v334_v10 = vadd.s32 %v328_v23, %v324_v15  ;;  %v525_v32 = vxor.u32 2147483648, %v524_v63  ;;  %v333_v44 = vsel %vm332_vm15, 1, %v1473_v2  ;;  %v1385_v50 = vadd.s32 4294967169, %v561_v7 }
  0xdd   :  { %v318_v17 = vadd.s32 %v317_v52, %v307_v58  ;;  %v285_v6 = vsel %vm281_vm10, %v265_v42, %v1716_v5  ;;  %v287_v43 = vsel %vm283_vm11, %v1710_v3, %v286_v49  ;;  %v335_v62 = vadd.s32 %v333_v44, %v327_v8 }
  0xde   :  { %vm336_vm9 = vc.u32 %v334_v10, %v330_v9  ;;  %v526_v55 = vsel %vm405_vm6, %v525_v32, %v524_v63  ;;  %v309_v61 = vshrl.u32 %v1772_v0, 16  ;;  %v567_v53 = vadd.s32 1, %v1385_v50 }
  0xdf   :  { %v337_v1 = vsel %vm336_vm9, 1, %v1473_v2  ;;  %v529_v25 = vsel %vm1777_vm8, %v1567_v12, %v526_v55  ;;  %v1170_v19 = vadd.s32 3, %v530_v59  ;;  %v329_v5 = vshrl.u32 %v325_v21, 16 }
  0xe0   :  { %v339_v26 = vadd.s32 %v337_v1, %v335_v62  ;;  %v531_v22 = vmul.f32 %v529_v25, %v529_v25  ;;  %v288_v3 = vsel %vm282_vm13, %v285_v6, %v287_v43  ;;  %v1831_v36 = vadd.s32 %v318_v17, %v309_v61 }
  0xe1   :  { %vm568_vm10 = vcmp.gt.s32.totalorder %v567_v53, 0  ;;  %v331_v28 = vshrl.u32 %v326_v39, 16  ;;  %v564_v0 = vand.u32 8388607, %v557_v11  ;;  %v1835_v16 = vadd.s32 %v334_v10, %v330_v9 }
  0xe2   :  { %v340_v20 = vadd.s32 %v339_v26, %v329_v5  ;;  %v569_v27 = vsel %vm568_vm10, %v567_v53, 0  ;;  %v532_v41 = vmul.f32 -0.001358992, %v531_v22  ;;  %v539_v29 = vmul.f32 -0.00019511016, %v531_v22 }
  0xe3   :  { %v571_v13 = vand.u32 31, %v569_v27  ;;  %v1837_v14 = vand.u32 3, %v530_v59  ;;  %v1839_v18 = vand.u32 3, %v1170_v19  ;;  %vm344_vm11 = vc.u32 %v1831_v36, %v1835_v16 }
  0xe4   :  { %v341_v35 = vadd.s32 %v340_v20, %v331_v28  ;;  %v533_v30 = vadd.f32 0.041655596, %v532_v41  ;;  %v540_v33 = vadd.f32 0.008332121, %v539_v29  ;;  %v342_v24 = vmul.u32 %v1745_v31, %v288_v3 }
  0xe5   :  { %v1843_v34 = vsub.s32 32, %v571_v13  ;;  %v565_v21 = vor.u32 8388608, %v564_v0  ;;  %v1846_v39 = vshrl.u32 %v569_v27, 5  ;;  %v583_v46 = vshll.u32 %v1479_v54, %v571_v13 }
  0xe6   :  { %v345_v37 = vadd.s32 1, %v341_v35  ;;  %v534_v48 = vmul.f32 %v533_v30, %v531_v22  ;;  %v541_v40 = vmul.f32 %v540_v33, %v531_v22  ;;  %vm552_vm13 = vcmp.eq.s32.totalorder %v1837_v14, 2 }
  0xe7   :  { %v575_v42 = vshrl.u32 %v1477_v47, %v1843_v34  ;;  %v578_v52 = vshrl.u32 %v1478_v51, %v1843_v34  ;;  %v581_v15 = vshrl.u32 %v1479_v54, %v1843_v34  ;;  %v584_v31 = vshrl.u32 %v1480_v57, %v1843_v34 }
  0xe8   :  { %v346_v49 = vsel %vm344_vm11, %v345_v37, %v341_v35  ;;  %v535_v23 = vadd.f32 -0.4999988, %v534_v48  ;;  %v542_v63 = vadd.f32 -0.16666654, %v541_v40  ;;  %v574_v58 = vshll.u32 %v1476_v45, %v571_v13 }
  0xe9   :  { %v347_v59 = vadd.s32 %v346_v49, %v342_v24  ;;  %vm549_vm0 = vcmp.eq.s32.totalorder %v1837_v14, 0  ;;  %v577_v7 = vshll.u32 %v1477_v47, %v571_v13  ;;  %v580_v8 = vshll.u32 %v1478_v51, %v571_v13 }
  0xea   :  { %v585_v9 = vor.u32 %v584_v31, %v583_v46  ;;  %v586_v10 = vshll.u32 %v1480_v57, %v571_v13  ;;  %v536_v54 = vmul.f32 %v535_v23, %v531_v22  ;;  %v543_v32 = vmul.f32 %v542_v63, %v531_v22 }
  0xeb   :  { %vm548_vm1 = vcmp.lt.s32.totalorder %v1837_v14, 2  ;;  %v348_v17 = vadd.s32 536870912, %v347_v59  ;;  %v587_v44 = vshrl.u32 %v1481_v60, %v1843_v34  ;;  %vm1172_vm3 = vcmp.lt.s32.totalorder %v1839_v18, 2 }
  0xec   :  { %v1867_v50 = vor.u32 %v575_v42, %v574_v58  ;;  %v1869_v6 = vor.u32 %v578_v52, %v577_v7  ;;  %v1871_v47 = vor.u32 %v581_v15, %v580_v8  ;;  %v537_v51 = vadd.f32 1.0, %v536_v54 }
  0xed   :  { %v544_v43 = vadd.f32 1.0, %v543_v32  ;;  %v1873_v62 = vshrl.u32 %v348_v17, 30  ;;  %v588_v57 = vor.u32 %v587_v44, %v586_v10  ;;  %vm1173_vm4 = vcmp.eq.s32.totalorder %v1839_v18, 0 }
  0xee   :  { %vm1176_vm5 = vcmp.eq.s32.totalorder %v1839_v18, 2  ;;  %vm592_vm6 = vcmp.lt.s32.totalorder %v1846_v39, 4  ;;  %v1878_v60 = vshll.u32 %v565_v21, 8  ;;  %v553_v61 = vxor.u32 2147483648, %v537_v51 }
  0xef   :  { %v545_v55 = vmul.f32 %v544_v43, %v529_v25  ;;  %v350_v1 = vshll.u32 %v1873_v62, 30  ;;  %v598_v53 = vsel %vm592_vm6, %v585_v9, 920167782  ;;  %vm589_vm7 = vcmp.lt.s32.totalorder %v1846_v39, 1 }
  0xf0   :  { %vm590_vm8 = vcmp.lt.s32.totalorder %v1846_v39, 2  ;;  %vm591_vm12 = vcmp.lt.s32.totalorder %v1846_v39, 3  ;;  %v602_v19 = vsel %vm592_vm6, %v588_v57, 1326507024  ;;  %v597_v25 = vsel %vm589_vm7, %v1867_v50, %v1869_v6 }
  0xf1   :  { %v550_v5 = vxor.u32 2147483648, %v545_v55  ;;  %v351_v26 = vsub.s32 %v347_v59, %v350_v1  ;;  %v601_v22 = vsel %vm589_vm7, %v1869_v6, %v1871_v47  ;;  %v554_v3 = vsel %vm552_vm13, %v553_v61, %v545_v55 }
  0xf2   :  { %v1178_v28 = vsel %vm1176_vm5, %v553_v61, %v545_v55  ;;  %v599_v20 = vsel %vm591_vm12, %v1871_v47, %v598_v53  ;;  %v603_v0 = vsel %vm591_vm12, %v585_v9, %v602_v19  ;;  %vm546_vm15 = vweird.f32 %v1567_v12 }
  0xf3   :  { %v551_v27 = vsel %vm549_vm0, %v537_v51, %v550_v5  ;;  %v1175_v41 = vsel %vm1173_vm4, %v537_v51, %v550_v5  ;;  %vm352_vm14 = vcmp.lt.s32.totalorder %v351_v26, 0  ;;  %v353_v29 = vsub.s32 0, %v351_v26 }
  0xf4   :  { %v555_v13 = vsel %vm548_vm1, %v551_v27, %v554_v3  ;;  %v1179_v35 = vsel %vm1172_vm3, %v1175_v41, %v1178_v28  ;;  %v604_v30 = vsel %vm590_vm8, %v601_v22, %v603_v0  ;;  %v600_v21 = vsel %vm590_vm8, %v597_v25, %v599_v20 }
  0xf5   :  { %v556_v33 = vsel %vm546_vm15, nan, %v555_v13  ;;  %v1180_v24 = vsel %vm546_vm15, nan, %v1179_v35  ;;  %v354_v37 = vsel %vm352_vm14, %v353_v29, %v351_v26  ;;  %v606_v12 = vand.u32 65535, %v1878_v60 }
  0xf6   :  { %1338 = vst.msk [vmem:[#allocation4 + $0x10] sm:$0xff] %vm711_vm2, %v1180_v24  ;;  %v355_v48 = vclz %v354_v37  ;;  %v608_v40 = vand.u32 65535, %v604_v30  ;;  %v609_v14 = vshrl.u32 %v604_v30, 16  ;;  %v607_v18 = vshrl.u32 %v1878_v60, 16 }
  0xf7   :  { %714 = vst.msk [vmem:[#allocation2 + $0x10] sm:$0xff] %vm711_vm2, %v556_v33  ;;  %v630_v49 = vand.u32 65535, %v600_v21  ;;  %v631_v15 = vshrl.u32 %v600_v21, 16  ;;  %v343_v31 = vadd.s32 %v1835_v16, %v1831_v36  ;;  %v594_v20 = vsel %vm592_vm6, %v1871_v47, 2102212464 }
  0xf8   :  { %v1380_v42 = vadd.s32 4294967294, %v355_v48  ;;  %v611_v46 = vmul.u32 %v609_v14, %v606_v12  ;;  %v612_v52 = vmul.u32 %v608_v40, %v607_v18  ;;  %v610_v63 = vmul.u32 %v608_v40, %v606_v12 }
  0xf9   :  { %v613_v59 = vmul.u32 %v609_v14, %v607_v18  ;;  %v632_v10 = vmul.u32 %v630_v49, %v606_v12  ;;  %v633_v32 = vmul.u32 %v631_v15, %v606_v12  ;;  %v634_v17 = vmul.u32 %v630_v49, %v607_v18 }
  0xfa   :  { %vm1381_vm9 = vcmp.lt.s32.totalorder %v1380_v42, 0  ;;  %v614_v58 = vshll.u32 %v611_v46, 16  ;;  %v616_v9 = vshll.u32 %v612_v52, 16  ;;  %v615_v55 = vshrl.u32 %v611_v46, 16 }
  0xfb   :  { %v358_v23 = vsel %vm1381_vm9, 0, %v1380_v42  ;;  %v636_v16 = vshll.u32 %v633_v32, 16  ;;  %v635_v19 = vmul.u32 %v631_v15, %v607_v18  ;;  %v638_v25 = vshll.u32 %v634_v17, 16 }
  0xfc   :  { %v359_v7 = vsub.s32 32, %v358_v23  ;;  %v363_v8 = vsub.s32 4294967266, %v358_v23  ;;  %vm618_vm10 = vc.u32 %v610_v63, %v614_v58  ;;  %v620_v54 = vadd.s32 %v614_v58, %v610_v63 }
  0xfd   :  { %v360_v44 = vshll.u32 %v351_v26, %v358_v23  ;;  %v619_v57 = vsel %vm618_vm10, 1, %v1473_v2  ;;  %vm640_vm13 = vc.u32 %v632_v10, %v636_v16  ;;  %v642_v22 = vadd.s32 %v636_v16, %v632_v10 }
  0xfe   :  { %v361_v51 = vshrl.u32 %v343_v31, %v359_v7  ;;  %v364_v43 = vadd.s32 127, %v363_v8  ;;  %v621_v36 = vadd.s32 %v619_v57, %v613_v59  ;;  %vm622_vm11 = vc.u32 %v620_v54, %v616_v9 }
  0xff   :  { %v623_v53 = vsel %vm622_vm11, 1, %v1473_v2  ;;  %v573_v26 = vshrl.u32 %v1476_v45, %v1843_v34  ;;  %v641_v28 = vsel %vm640_vm13, 1, %v1473_v2  ;;  %vm644_vm0 = vc.u32 %v642_v22, %v638_v25 }
 0x100   :  { %v362_v61 = vor.u32 %v361_v51, %v360_v44  ;;  %v365_v1 = vshll.u32 %v364_v43, 23  ;;  %v625_v5 = vadd.s32 %v623_v53, %v621_v36  ;;  %v643_v27 = vadd.s32 %v641_v28, %v635_v19 }
 0x101   :  { %v617_v13 = vshrl.u32 %v612_v52, 16  ;;  %v645_v35 = vsel %vm644_vm0, 1, %v1473_v2  ;;  %v637_v30 = vshrl.u32 %v633_v32, 16  ;;  %v593_v45 = vsel %vm589_vm7, %v573_v26, %v1867_v50 }
 0x102   :  { %v366_v3 = vor.u32 4788187, %v365_v1  ;;  %v626_v0 = vadd.s32 %v625_v5, %v615_v55  ;;  %v369_v29 = vcvt.s32.f32 %v362_v61  ;;  %v647_v33 = vadd.s32 %v645_v35, %v643_v27 }
 0x103   :  { %v595_v34 = vsel %vm591_vm12, %v1869_v6, %v594_v20  ;;  %v639_v37 = vshrl.u32 %v634_v17, 16  ;;  %v646_v12 = vadd.s32 %v642_v22, %v638_v25  ;;  %vm251_vm1 = vcmp.lt.s32.totalorder %v1637_v4, 0 }
 0x104   :  { %v367_v41 = vand.u32 2147483647, %v366_v3  ;;  %v1939_v47 = vadd.s32 %v626_v0, %v617_v13  ;;  %v648_v21 = vadd.s32 %v647_v33, %v637_v30  ;;  %v596_v2 = vsel %vm590_vm8, %v593_v45, %v595_v34 }
 0x105   :  { %vm1946_vm3 = vcmp.le.f32.partialorder %v249_v38, 0.7853982  ;;  %v373_v6 = vsub.s32 4, %v1873_v62  ;;  %v650_v39 = vmul.u32 %v1878_v60, %v596_v2  ;;  %vm392_vm9 = vweird.f32 %v1637_v4 }
 0x106   :  { %v370_v24 = vmul.f32 %v369_v29, %v367_v41  ;;  %v649_v40 = vadd.s32 %v648_v21, %v639_v37  ;;  %vm652_vm4 = vc.u32 %v1939_v47, %v646_v12  ;;  %v651_v29 = vadd.s32 %v646_v12, %v1939_v47 }
 0x107   :  { %v374_v31 = vsel %vm251_vm1, %v373_v6, %v1873_v62  ;;  %vm559_vm11 = vcmp.lt.s32.totalorder %v1766_v56, 0  ;;  %vm558_vm13 = vcmp.le.f32.partialorder %v557_v11, 0.7853982 }
 0x108   :  { %v371_v48 = vxor.u32 2147483648, %v370_v24  ;;  %v653_v42 = vadd.s32 1, %v649_v40  ;;  %v376_v58 = vsel %vm1946_vm3, 0, %v374_v31 }
 0x109   :  { %v1015_v17 = vadd.s32 3, %v376_v58  ;;  %v393_v43 = vand.u32 3, %v376_v58 }
 0x10a   :  { %v372_v14 = vsel %vm251_vm1, %v371_v48, %v370_v24  ;;  %v654_v49 = vsel %vm652_vm4, %v653_v42, %v649_v40 }
 0x10b   :  { %v375_v18 = vsel %vm1946_vm3, %v1637_v4, %v372_v14  ;;  %v655_v38 = vadd.s32 %v654_v49, %v650_v39  ;;  %v1016_v36 = vand.u32 3, %v1015_v17  ;;  %vm394_vm6 = vcmp.lt.s32.totalorder %v393_v43, 2 }
 0x10c   :  { %v377_v46 = vmul.f32 %v375_v18, %v375_v18  ;;  %vm395_vm7 = vcmp.eq.s32.totalorder %v393_v43, 0  ;;  %vm398_vm8 = vcmp.eq.s32.totalorder %v393_v43, 2 }
 0x10d   :  { %v656_v59 = vadd.s32 536870912, %v655_v38  ;;  %vm1017_vm12 = vcmp.lt.s32.totalorder %v1016_v36, 2  ;;  %vm1018_vm14 = vcmp.eq.s32.totalorder %v1016_v36, 0  ;;  %vm1021_vm15 = vcmp.eq.s32.totalorder %v1016_v36, 2 }
 0x10e   :  { %v378_v52 = vmul.f32 -0.001358992, %v377_v46  ;;  %v385_v15 = vmul.f32 -0.00019511016, %v377_v46 }
 0x10f   :  { %v657_v9 = vshrl.u32 %v656_v59, 30 }
 0x110   :  { %v379_v23 = vadd.f32 0.041655596, %v378_v52  ;;  %v386_v63 = vadd.f32 0.008332121, %v385_v15 }
 0x111   :  { %v658_v32 = vshll.u32 %v657_v9, 30  ;;  %v681_v12 = vsub.s32 4, %v657_v9 }
 0x112   :  { %v380_v7 = vmul.f32 %v379_v23, %v377_v46  ;;  %v387_v8 = vmul.f32 %v386_v63, %v377_v46 }
 0x113   :  { %v659_v51 = vsub.s32 %v655_v38, %v658_v32 }
 0x114   :  { %v381_v10 = vadd.f32 -0.4999988, %v380_v7  ;;  %v388_v54 = vadd.f32 -0.16666654, %v387_v8 }
 0x115   :  { %vm660_vm5 = vcmp.lt.s32.totalorder %v659_v51, 0  ;;  %v661_v62 = vsub.s32 0, %v659_v51 }
 0x116   :  { %v382_v60 = vmul.f32 %v381_v10, %v377_v46  ;;  %v389_v44 = vmul.f32 %v388_v54, %v377_v46 }
 0x117   :  { %v662_v1 = vsel %vm660_vm5, %v661_v62, %v659_v51 }
 0x118   :  { %v383_v57 = vadd.f32 1.0, %v382_v60  ;;  %v390_v55 = vadd.f32 1.0, %v389_v44  ;;  %v663_v53 = vclz %v662_v1 }
 0x11a   :  { %v391_v16 = vmul.f32 %v390_v55, %v375_v18  ;;  %v399_v61 = vxor.u32 2147483648, %v383_v57  ;;  %v1386_v5 = vadd.s32 4294967294, %v663_v53  ;;  %v682_v18 = vsel %vm559_vm11, %v681_v12, %v657_v9 }
 0x11b   :  { %v684_v39 = vsel %vm558_vm13, 0, %v682_v18 }
 0x11c   :  { %v396_v19 = vxor.u32 2147483648, %v391_v16  ;;  %v400_v22 = vsel %vm398_vm8, %v399_v61, %v391_v16  ;;  %v1023_v26 = vsel %vm1021_vm15, %v399_v61, %v391_v16  ;;  %vm1387_vm10 = vcmp.lt.s32.totalorder %v1386_v5, 0 }
 0x11d   :  { %v666_v41 = vsel %vm1387_vm10, 0, %v1386_v5  ;;  %v1325_v31 = vadd.s32 3, %v684_v39  ;;  %v701_v58 = vand.u32 3, %v684_v39 }
 0x11e   :  { %v397_v25 = vsel %vm395_vm7, %v383_v57, %v396_v19  ;;  %v1020_v3 = vsel %vm1018_vm14, %v383_v57, %v396_v19  ;;  %v667_v13 = vsub.s32 32, %v666_v41  ;;  %v671_v35 = vsub.s32 4294967266, %v666_v41 }
 0x11f   :  { %v401_v28 = vsel %vm394_vm6, %v397_v25, %v400_v22  ;;  %v1024_v20 = vsel %vm1017_vm12, %v1020_v3, %v1023_v26  ;;  %v668_v30 = vshll.u32 %v659_v51, %v666_v41  ;;  %v1326_v7 = vand.u32 3, %v1325_v31 }
 0x120   :  { %v402_v0 = vsel %vm392_vm9, nan, %v401_v28  ;;  %v1025_v27 = vsel %vm392_vm9, nan, %v1024_v20  ;;  %v669_v33 = vshrl.u32 %v651_v29, %v667_v13  ;;  %v672_v24 = vadd.s32 127, %v671_v35 }
 0x121   :  { %1337 = vst.msk [vmem:[#allocation4 + $0x8] sm:$0xff] %vm711_vm2, %v1025_v27  ;;  %vm702_vm0 = vcmp.lt.s32.totalorder %v701_v58, 2  ;;  %vm703_vm1 = vcmp.eq.s32.totalorder %v701_v58, 0  ;;  %vm706_vm3 = vcmp.eq.s32.totalorder %v701_v58, 2  ;;  %vm1327_vm4 = vcmp.lt.s32.totalorder %v1326_v7, 2 }
 0x122   :  { %713 = vst.msk [vmem:[#allocation2 + $0x8] sm:$0xff] %vm711_vm2, %v402_v0  ;;  %v670_v45 = vor.u32 %v669_v33, %v668_v30  ;;  %v673_v34 = vshll.u32 %v672_v24, 23  ;;  %vm1328_vm5 = vcmp.eq.s32.totalorder %v1326_v7, 0  ;;  %vm1331_vm6 = vcmp.eq.s32.totalorder %v1326_v7, 2 }
 0x123   :  { %vm700_vm7 = vweird.f32 %v1766_v56 }
 0x124   :  { %v674_v4 = vor.u32 4788187, %v673_v34  ;;  %v677_v21 = vcvt.s32.f32 %v670_v45 }
 0x126   :  { %v675_v37 = vand.u32 2147483647, %v674_v4 }
 0x128   :  { %v678_v48 = vmul.f32 %v677_v21, %v675_v37 }
 0x12a   :  { %v679_v2 = vxor.u32 2147483648, %v678_v48 }
 0x12c   :  { %v680_v47 = vsel %vm559_vm11, %v679_v2, %v678_v48 }
 0x12d   :  { %v683_v40 = vsel %vm558_vm13, %v1766_v56, %v680_v47 }
 0x12e   :  { %v685_v50 = vmul.f32 %v683_v40, %v683_v40 }
 0x130   :  { %v686_v14 = vmul.f32 -0.001358992, %v685_v50  ;;  %v693_v6 = vmul.f32 -0.00019511016, %v685_v50 }
 0x132   :  { %v687_v42 = vadd.f32 0.041655596, %v686_v14  ;;  %v694_v46 = vadd.f32 0.008332121, %v693_v6 }
 0x134   :  { %v688_v49 = vmul.f32 %v687_v42, %v685_v50  ;;  %v695_v52 = vmul.f32 %v694_v46, %v685_v50 }
 0x136   :  { %v689_v15 = vadd.f32 -0.4999988, %v688_v49  ;;  %v696_v38 = vadd.f32 -0.16666654, %v695_v52 }
 0x138   :  { %v690_v23 = vmul.f32 %v689_v15, %v685_v50  ;;  %v697_v63 = vmul.f32 %v696_v38, %v685_v50 }
 0x13a   :  { %v691_v59 = vadd.f32 1.0, %v690_v23  ;;  %v698_v11 = vadd.f32 1.0, %v697_v63 }
 0x13c   :  { %v699_v8 = vmul.f32 %v698_v11, %v683_v40  ;;  %v707_v10 = vxor.u32 2147483648, %v691_v59 }
 0x13e   :  { %v704_v54 = vxor.u32 2147483648, %v699_v8  ;;  %v708_v32 = vsel %vm706_vm3, %v707_v10, %v699_v8  ;;  %v1333_v60 = vsel %vm1331_vm6, %v707_v10, %v699_v8 }
 0x140   :  { %v705_v9 = vsel %vm703_vm1, %v691_v59, %v704_v54  ;;  %v1330_v17 = vsel %vm1328_vm5, %v691_v59, %v704_v54 }
 0x141   :  { %v709_v44 = vsel %vm702_vm0, %v705_v9, %v708_v32  ;;  %v1334_v51 = vsel %vm1327_vm4, %v1330_v17, %v1333_v60 }
 0x142   :  { %v710_v43 = vsel %vm700_vm7, nan, %v709_v44  ;;  %v1335_v57 = vsel %vm700_vm7, nan, %v1334_v51 }
 0x143   :  { %1339 = vst.msk [vmem:[#allocation4 + $0x18] sm:$0xff] %vm711_vm2, %v1335_v57 }
 0x144   :  { %715 = vst.msk [vmem:[#allocation2 + $0x18] sm:$0xff] %vm711_vm2, %v710_v43  ;;  %1365 = dma.vmem_to_hbm [thread:$0]  %s1358_s1, 512, %s1360_s24, [#allocation5], %s1484_s2, %s1484_s2, %s1485_s3  }
 0x145   :  { %1352 = dma.vmem_to_hbm [thread:$0]  %s1345_s26, 512, %s1347_s29, [#allocation3], %s1484_s2, %s1484_s2, %s1485_s3  }
 0x146   :  { %1469 = dma.done.wait [#allocation3], 512  }
 0x147   :  { %1470 = vsyncadd [#allocation3], 4294966784 }
 0x148   :  { %1471 = dma.done.wait [#allocation5], 512  }
 0x149   :  { %1472 = vsyncadd [#allocation5], 4294966784 }
 0x14a   :  { %1374 = vsyncpa [#allocation3], 1 }
 0x14b   :  { %1375 = vsyncpa [#allocation5], 1 }

</bundles_post_ra>
